<compile_context>
chip_gen: v6e
topology: v6e:2x2x1
jax: 0.10.0
libtpu: 0.0.40
codegen_flags: <defaults>
</compile_context>

<pallas_src>
import functools

import jax
import jax.numpy as jnp
from jax.experimental import pallas as pl
from jax.experimental.pallas import tpu as pltpu

LANE = 128
N_SPLITS = 2          # megacore split on v7x; harmless sequential loop on v5e/v6e
MAX_TILE_ROWS = 512   # 512*128*4B = 256 KiB per input buffer -> ~1 MiB double-buffered


def _cdiv(a, b):
    return (a + b - 1) // b


def _round_up(a, b):
    return _cdiv(a, b) * b


def _int_pow(v, g):
    """Exponentiation by squaring with static integer exponent (VPU multiplies only)."""
    assert g >= 1
    result = None
    base = v
    while g > 0:
        if g & 1:
            result = base if result is None else result * base
        g >>= 1
        if g:
            base = base * base
    return result


def _focal_loss_kernel(pred_ref, target_ref, out_ref, *, alpha, gamma, total,
                       tile_r, tiles_per_split, need_mask):
    c = pl.program_id(0)   # megacore split index ("parallel")
    i = pl.program_id(1)   # tile index within the split ("arbitrary" / reduction)

    @pl.when(i == 0)
    def _():
        out_ref[...] = jnp.zeros_like(out_ref)

    x = pred_ref[...].astype(jnp.float32)
    t = target_ref[...].astype(jnp.float32)

    # Numerically-stable BCE with logits (reduction='none'):
    #   ce = max(x, 0) - x*t + log1p(exp(-|x|))
    ce = jnp.maximum(x, 0.0) - x * t + jnp.log1p(jnp.exp(-jnp.abs(x)))

    # alpha blend, constants folded at trace time:
    #   t*a + (1-t)*(1-a) == (2a - 1)*t + (1 - a)
    a = (2.0 * alpha - 1.0) * t + (1.0 - alpha)

    # d = 1 - pt, with pt = where(t == 1, x, 1 - x)  (raw logits, as in the reference)
    d = jnp.where(t == 1.0, 1.0 - x, x)

    if float(gamma).is_integer():
        g = int(gamma)
        w = jnp.ones_like(d) if g == 0 else _int_pow(d, g)
    else:
        # Non-integer gamma: match the reference pow semantics (may NaN for negative base).
        w = jnp.power(d, jnp.float32(gamma))

    focal = a * w * ce

    if need_mask:
        # Zero out padded tail elements (global flat index >= total).
        row_base = (c * tiles_per_split + i) * tile_r
        rows_idx = jax.lax.broadcasted_iota(jnp.int32, focal.shape, 0) + row_base
        lanes_idx = jax.lax.broadcasted_iota(jnp.int32, focal.shape, 1)
        gidx = rows_idx * LANE + lanes_idx
        focal = jnp.where(gidx < total, focal, 0.0)

    # (tile_r, 128) -> (8, 128) partial: pure vreg-wise VPU adds (no XLU in the hot loop).
    partial = focal.reshape(tile_r // 8, 8, LANE).sum(axis=0)
    out_ref[...] += partial.reshape(1, 8, LANE)


def focal_loss(pred, target, alpha=0.25, gamma=2.0):
    """Pallas TPU focal loss. pred/target can be any (matching) shape; returns scalar f32."""
    assert pred.shape == target.shape
    total = int(pred.size)
    assert total > 0

    rows = _cdiv(total, LANE)
    tile_r = min(MAX_TILE_ROWS, _round_up(max(_cdiv(rows, N_SPLITS), 8), 8))
    tiles_total = _cdiv(rows, tile_r)
    tiles_per_split = _cdiv(tiles_total, N_SPLITS)
    padded_rows = N_SPLITS * tiles_per_split * tile_r
    padded_total = padded_rows * LANE
    need_mask = padded_total != total

    # Keep the source dtype (e.g. bf16) on the HBM->VMEM path; cast to f32 inside the kernel.
    p = pred.reshape(-1)
    t = target.reshape(-1)
    if padded_total != total:
        p = jnp.pad(p, (0, padded_total - total))
        t = jnp.pad(t, (0, padded_total - total))
    p2 = p.reshape(padded_rows, LANE)
    t2 = t.reshape(padded_rows, LANE)

    kernel = functools.partial(
        _focal_loss_kernel,
        alpha=float(alpha),
        gamma=float(gamma),
        total=total,
        tile_r=tile_r,
        tiles_per_split=tiles_per_split,
        need_mask=need_mask,
    )

    partials = pl.pallas_call(
        kernel,
        out_shape=jax.ShapeDtypeStruct((N_SPLITS, 8, LANE), jnp.float32),
        grid_spec=pl.GridSpec(
            grid=(N_SPLITS, tiles_per_split),
            in_specs=[
                pl.BlockSpec((tile_r, LANE), lambda c, i: (c * tiles_per_split + i, 0)),
                pl.BlockSpec((tile_r, LANE), lambda c, i: (c * tiles_per_split + i, 0)),
            ],
            out_specs=pl.BlockSpec((1, 8, LANE), lambda c, i: (c, 0, 0)),
        ),
        compiler_params=pltpu.CompilerParams(
            dimension_semantics=("parallel", "arbitrary"),
            vmem_limit_bytes=32 * 1024 * 1024,
        ),
    )(p2, t2)

    # Tiny epilogue in XLA: sum the 2 lane-dense partial blocks and take the mean.
    return jnp.sum(partials) / jnp.float32(total)


def _focal_loss_ref(pred, target, alpha=0.25, gamma=2.0):
    """Pure-JAX reference (mirrors the PyTorch module)."""
    x = pred.astype(jnp.float32)
    t = target.astype(jnp.float32)
    ce = jnp.maximum(x, 0.0) - x * t + jnp.log1p(jnp.exp(-jnp.abs(x)))
    a = t * alpha + (1.0 - t) * (1.0 - alpha)
    pt = jnp.where(t == 1.0, x, 1.0 - x)
    return jnp.mean(a * (1.0 - pt) ** gamma * ce)


if __name__ == "__main__":
    key = jax.random.PRNGKey(0)
    k_pred, k_tgt = jax.random.split(key)

    # Small NCHW shapes consistent with a detection-style focal loss input.
    shape = (2, 4, 16, 16)  # 2048 elements
    pred = jax.random.normal(k_pred, shape, dtype=jnp.float32)
    target = (jax.random.uniform(k_tgt, shape) < 0.3).astype(jnp.float32)

    loss = focal_loss(pred, target, alpha=0.25, gamma=2.0)
    loss = jax.block_until_ready(loss)

    ref = _focal_loss_ref(pred, target, alpha=0.25, gamma=2.0)
    assert jnp.allclose(loss, ref, rtol=1e-5, atol=1e-5), (loss, ref)

    print("KERNEL_OK")
</pallas_src>

<mosaic_0001>
module attributes {stable_mosaic.version = 11 : i64} {
  func.func @_focal_loss_kernel(%arg0: i32, %arg1: i32, %arg2: memref<8x128xf32, #tpu.memory_space<vmem>>, %arg3: memref<8x128xf32, #tpu.memory_space<vmem>>, %arg4: memref<1x8x128xf32, #tpu.memory_space<vmem>>) attributes {dimension_semantics = [#tpu.dimension_semantics<parallel>, #tpu.dimension_semantics<arbitrary>], iteration_bounds = array<i64: 2, 1>, scalar_prefetch = 0 : i64, scratch_operands = 0 : i64, tpu.core_type = #tpu.core_type<tc>, window_params = [{transform_indices = @transform_0, window_bounds = array<i64: 8, 128>}, {transform_indices = @transform_1, window_bounds = array<i64: 8, 128>}, {transform_indices = @transform_2, window_bounds = array<i64: 1, 8, 128>}]} {
    %c0_i32 = arith.constant 0 : i32
    %0 = arith.cmpi eq, %arg1, %c0_i32 : i32
    %1 = arith.extui %0 : i1 to i32
    %c0_i32_0 = arith.constant 0 : i32
    %2 = arith.cmpi ne, %1, %c0_i32_0 : i32
    scf.if %2 {
      %cst_16 = arith.constant 0.000000e+00 : f32
      %33 = vector.broadcast %cst_16 : f32 to vector<1x8x128xf32>
      %c0_17 = arith.constant 0 : index
      %c0_18 = arith.constant 0 : index
      %c0_19 = arith.constant 0 : index
      %34 = vector.load %arg4[%c0_17, %c0_18, %c0_19] : memref<1x8x128xf32, #tpu.memory_space<vmem>>, vector<1x8x128xf32>
      tpu.vector_store %arg4[%c0_17, %c0_18, %c0_19], %33 {strides = array<i32>} : memref<1x8x128xf32, #tpu.memory_space<vmem>>, vector<1x8x128xf32>,
    } else {
    }
    %c0 = arith.constant 0 : index
    %c0_1 = arith.constant 0 : index
    %3 = vector.load %arg2[%c0, %c0_1] : memref<8x128xf32, #tpu.memory_space<vmem>>, vector<8x128xf32>
    %c0_2 = arith.constant 0 : index
    %c0_3 = arith.constant 0 : index
    %4 = vector.load %arg3[%c0_2, %c0_3] : memref<8x128xf32, #tpu.memory_space<vmem>>, vector<8x128xf32>
    %cst = arith.constant 0.000000e+00 : f32
    %5 = vector.broadcast %cst : f32 to vector<8x128xf32>
    %6 = arith.maximumf %3, %5 : vector<8x128xf32>
    %7 = arith.mulf %3, %4 : vector<8x128xf32>
    %8 = arith.subf %6, %7 : vector<8x128xf32>
    %9 = math.absf %3 : vector<8x128xf32>
    %cst_4 = arith.constant 0.000000e+00 : f32
    %10 = vector.broadcast %cst_4 : f32 to vector<8x128xf32>
    %11 = arith.subf %10, %9 : vector<8x128xf32>
    %12 = math.exp %11 : vector<8x128xf32>
    %13 = math.log1p %12 : vector<8x128xf32>
    %14 = arith.addf %8, %13 : vector<8x128xf32>
    %cst_5 = arith.constant -5.000000e-01 : f32
    %15 = vector.broadcast %cst_5 : f32 to vector<8x128xf32>
    %16 = arith.mulf %15, %4 : vector<8x128xf32>
    %cst_6 = arith.constant 7.500000e-01 : f32
    %17 = vector.broadcast %cst_6 : f32 to vector<8x128xf32>
    %18 = arith.addf %16, %17 : vector<8x128xf32>
    %cst_7 = arith.constant 1.000000e+00 : f32
    %19 = vector.broadcast %cst_7 : f32 to vector<8x128xf32>
    %20 = arith.cmpf oeq, %4, %19 : vector<8x128xf32>
    %cst_8 = arith.constant 1.000000e+00 : f32
    %21 = vector.broadcast %cst_8 : f32 to vector<8x128xf32>
    %22 = arith.subf %21, %3 : vector<8x128xf32>
    %23 = arith.select %20, %22, %3 : vector<8x128xi1>, vector<8x128xf32>
    %24 = arith.mulf %23, %23 : vector<8x128xf32>
    %25 = arith.mulf %18, %24 : vector<8x128xf32>
    %26 = arith.mulf %25, %14 : vector<8x128xf32>
    %27 = vector.shape_cast %26 : vector<8x128xf32> to vector<1x8x128xf32>
    %cst_9 = arith.constant dense<0.000000e+00> : vector<8x128xf32>
    %28 = vector.multi_reduction <add>, %27, %cst_9 [0] : vector<1x8x128xf32> to vector<8x128xf32>
    %c0_10 = arith.constant 0 : index
    %c0_11 = arith.constant 0 : index
    %c0_12 = arith.constant 0 : index
    %29 = vector.load %arg4[%c0_10, %c0_11, %c0_12] : memref<1x8x128xf32, #tpu.memory_space<vmem>>, vector<1x8x128xf32>
    %30 = vector.shape_cast %28 : vector<8x128xf32> to vector<1x8x128xf32>
    %31 = arith.addf %29, %30 : vector<1x8x128xf32>
    %c0_13 = arith.constant 0 : index
    %c0_14 = arith.constant 0 : index
    %c0_15 = arith.constant 0 : index
    %32 = vector.load %arg4[%c0_13, %c0_14, %c0_15] : memref<1x8x128xf32, #tpu.memory_space<vmem>>, vector<1x8x128xf32>
    tpu.vector_store %arg4[%c0_13, %c0_14, %c0_15], %31 {strides = array<i32>} : memref<1x8x128xf32, #tpu.memory_space<vmem>>, vector<1x8x128xf32>,
    return
  }
  func.func @transform_0(%arg0: i32, %arg1: i32) -> (i32, i32) {
    %c1_i32 = arith.constant 1 : i32
    %0 = arith.muli %arg0, %c1_i32 : i32
    %1 = arith.addi %0, %arg1 : i32
    %c0_i32 = arith.constant 0 : i32
    %c0_i32_0 = arith.constant 0 : i32
    return %1, %c0_i32 : i32, i32
  }
  func.func @transform_1(%arg0: i32, %arg1: i32) -> (i32, i32) {
    %c1_i32 = arith.constant 1 : i32
    %0 = arith.muli %arg0, %c1_i32 : i32
    %1 = arith.addi %0, %arg1 : i32
    %c0_i32 = arith.constant 0 : i32
    %c0_i32_0 = arith.constant 0 : i32
    return %1, %c0_i32 : i32, i32
  }
  func.func @transform_2(%arg0: i32, %arg1: i32) -> (i32, i32, i32) {
    %c0_i32 = arith.constant 0 : i32
    %c0_i32_0 = arith.constant 0 : i32
    %c0_i32_1 = arith.constant 0 : i32
    return %arg0, %c0_i32, %c0_i32_0 : i32, i32, i32
  }
}

</mosaic_0001>

<bundles_post_ra>
// kernel: tpu_custom_call.1
= control target key start
LH: loop header
LB: loop body
LE: loop exit
PB: predicated region body
PF: predicated region fallthrough
CT: control target
= control target key end

     0   :  { %7 = vsyncpa [#allocation3], 0  ;;  %s783_s0 = inlined_call_operand.hbm [shape: f32[16,128], index: 0, kind: input, shape index: {}]   ;;  %s784_s1 = inlined_call_operand.hbm [shape: f32[16,128], index: 1, kind: input, shape index: {}]   ;;  %s785_s2 = inlined_call_operand.hbm [shape: f32[2,8,128], index: 2, kind: output, shape index: {}]  }
   0x1   :  { %9 = vsyncpa [#allocation3 + $0x1], 0 }
   0x2   :  { %10 = vsyncpa [#allocation6], 0 }
   0x3   :  { %12 = vsyncpa [#allocation6 + $0x1], 0 }
   0x4   :  { %13 = vsyncpa [#allocation4], 0 }
   0x5   :  { %15 = vsyncpa [#allocation4 + $0x1], 0  ;;  %s617_s9 = smov 0   ;;  %s619_s10 = smov 0  }
   0x6   :  { %s621_s11 = smov 0   ;;  %s623_s12 = smov 0  }
   0x7   :  { %s625_s13 = smov 0   ;;  %s627_s14 = smov 0  }
   0x8 LB: > { %s369_s15 = sadd.s32 4294967295, %s597_s14   ;;  %s370_s16 = sadd.s32 4294967294, %s597_s14   ;;  %s597_s14 = sphi %s627_s14, %s21_s14   ;;  %s593_s13 = sphi %s625_s13, %s797_s13   ;;  %s589_s12 = sphi %s623_s12, %s796_s12   ;;  %s585_s11 = sphi %s621_s11, %s795_s11   ;;  %s581_s10 = sphi %s619_s10, %s794_s10   ;;  %s577_s9 = sphi %s617_s9, %s793_s9  }
   0x9   : > { %s33_s17 = sadd.s32 1, %s593_s13  ;;  %s42_s18 = sadd.s32 1, %s585_s11 }
   0xa   : > { %p35_p0 = scmp.ge.s32.totalorder %s33_s17, 2  ;;  %p49_p1 = scmp.ne.s32.totalorder %s585_s11, %s581_s10 }
   0xb   : > { %p50_p2 = scmp.eq.s32.totalorder %s597_s14, 0  ;;  %p55_p3 = scmp.ne.s32.totalorder %s581_s10, %s577_s9 }
   0xc   : > { %s799_s17 = smov (%p35_p0, %s33_s17), 0  ;;  %p56_p5 = scmp.eq.s32.totalorder %s369_s15, 0 }
   0xd   : > { %p658_p4 = por %p50_p2, %p49_p1  ;;  %s39_s20 = ssub.s32 %s593_s13, %s799_s17 }
   0xe   : > { %p107_p6 = scmp.eq.s32.totalorder %s369_s15, 1  ;;  %p40_p7 = scmp.eq.s32.totalorder %s39_s20, 0 }
   0xf   : > { %p664_p8 = por %p56_p5, %p55_p3  ;;  %p113_p10 = scmp.eq.s32.totalorder %s370_s16, 1 }
  0x10   : > { %p668_p9 = por %p107_p6, %p49_p1  ;;  %p402_p13 = scmp.lt.s32.totalorder %s597_s14, 2 }
  0x11   : > { %s673_s23 = scalar_select %p40_p7, %s585_s11, %s42_s18  }
  0x12   : > { %p675_p11 = por %p113_p10, %p55_p3  ;;  %s682_s25 = sand.u32 1, %s585_s11  }
  0x13   : > { %s373_s26 = sshll.u32 %s682_s25, 3  ;;  %s374_s27 = sshll.u32 %s593_s13, 7 }
  0x14   : > { %s143_s30 = scalar_lea.hbm %s783_s0, %s374_s27  ;;  %s137_s3 = scalar_lea.vmem [#allocation2], %s373_s26 }
  0x15   : > { %s145_s4 = sshll.u32 %s137_s3, 4  ;;  %p691_p0 = pnand %p402_p13, %p658_p4  ;;  %s146_s4 = int_to_ptr.vmem [resolvable:$true] %s145_s4 }
  0x16   : > { %p377_p1 = scmp.ge.s32.totalorder %s597_s14, 1  ;;  %p169_p2 = scmp.lt.s32.totalorder %s597_s14, 3 }
  0x17   : > { %s134_s6 = scalar_lea.sflag [#allocation3], %s682_s25  ;;  %p459_p3 = pneg %p691_p0 }
  0x18   : > { %s470_s7 = scalar_lea.vmem %s146_s4, 128  ;;  %s599_s8 = smov [#allocation2]  }
  0x19   : > { %p471_p5 = scmp.ne.s32.totalorder %s146_s4, %s470_s7  ;;  %s475_s15 = sshll.u32 %s599_s8, 4  ;;  %s476_s15 = int_to_ptr.vmem [resolvable:$false] %s475_s15 }
  0x1a   : > { %s477_s16 = scalar_lea.vmem %s476_s15, 256  ;;  %p478_p4 = scmp.lt.s32.totalorder %s146_s4, %s476_s15 }
  0x1b   : > { %p473_p6 = pnand %p471_p5, %p459_p3  ;;  %p479_p10 = scmp.lt.s32.totalorder %s477_s16, %s470_s7 }
  0x1d   : > { %p474_p7 = pneg %p473_p6  ;;  %p480_p13 = por %p479_p10, %p478_p4 }
  0x1f   : > { %p481_p12 = pnand %p480_p13, %p474_p7 }
  0x21   : > { %484 = shalt.err (!%p481_p12)
}
  0x22   : > { %394 = dma.hbm_to_vmem [thread:$0]  (!%p691_p0), %s143_s30, 128, %s146_s4, %s134_s6  }
  0x23   : > { %p709_p5 = pnand %p377_p1, %p169_p2  ;;  %s162_s28 = scalar_lea.hbm %s784_s1, %s374_s27 }
  0x24   : > { %s156_s29 = scalar_lea.vmem [#allocation5], %s373_s26  ;;  %s153_s7 = scalar_lea.sflag [#allocation6], %s682_s25 }
  0x25   : > { %s164_s3 = sshll.u32 %s156_s29, 4  ;;  %s600_s30 = smov [#allocation5]   ;;  %s165_s3 = int_to_ptr.vmem [resolvable:$true] %s164_s3 }
  0x26   : > { %s498_s8 = scalar_lea.vmem %s165_s3, 128  ;;  %s503_s4 = sshll.u32 %s600_s30, 4  ;;  %s504_s4 = int_to_ptr.vmem [resolvable:$false] %s503_s4 }
  0x27   : > { %p499_p12 = scmp.ne.s32.totalorder %s165_s3, %s498_s8  ;;  %s505_s6 = scalar_lea.vmem %s504_s4, 256 }
  0x28   : > { %p506_p1 = scmp.lt.s32.totalorder %s165_s3, %s504_s4  ;;  %p507_p2 = scmp.lt.s32.totalorder %s505_s6, %s498_s8 }
  0x29   : > { %p501_p6 = pnand %p499_p12, %p459_p3 }
  0x2a   : > { %p508_p4 = por %p507_p2, %p506_p1 }
  0x2b   : > { %p502_p7 = pneg %p501_p6 }
  0x2d   : > { %p509_p10 = pnand %p508_p4, %p502_p7 }
  0x2f   : > { %512 = shalt.err (!%p509_p10)
}
  0x30   : > { %397 = dma.hbm_to_vmem [thread:$0]  (!%p691_p0), %s162_s28, 128, %s165_s3, %s153_s7  }
  0x31   : > { %173 = sbr.rel (%p709_p5) target bundleno = 114 (0x72), region = 28  ;;  %s725_s25 = sand.u32 (!%p709_p5), 1, %s581_s10  }
  0x32   : > { %s728_s26 = sshll.u32 (!%p709_p5), %s725_s25, 3  ;;  %s176_s27 = scalar_lea.sflag (!%p709_p5), [#allocation3], %s725_s25 }
  0x33   : > { %s179_s15 = scalar_lea.vmem (!%p709_p5), [#allocation2], %s728_s26 }
  0x36   : > { %564 = dma.done.wait (%p664_p8), %s176_s27, 128  }
  0x37   : > { %566 = vsyncadd (%p664_p8), %s176_s27, 4294967168  ;;  %s185_s5 = scalar_lea.sflag [#allocation6], %s725_s25  ;;  %s188_s16 = scalar_lea.vmem [#allocation5], %s728_s26 }
  0x38   : > { %568 = dma.done.wait (%p664_p8), %s185_s5, 128  }
  0x39   : > { %570 = vsyncadd (%p664_p8), %s185_s5, 4294967168  ;;  %v221_v0 = vld [vmem:[%s179_s15] sm:$0xff]  ;;  %v222_v6 = vld [vmem:[%s188_s16] sm:$0xff]  ;;  %s382_s21 = sshll.u32 %s589_s12, 7  ;;  %s213_s18 = scalar_lea.vmem [#allocation7], %s728_s26 }
  0x3a   : > { %v226_v1 = vand.u32 2147483647, %v221_v0  ;;  %v243_v8 = vsub.f32 1.0, %v221_v0  ;;  %vm242_vm0 = vcmp.eq.f32.partialorder %v222_v6, 1.0  ;;  %v240_v9 = vmul.f32 -0.5, %v222_v6  ;;  %s266_s19 = sshll.u32 %s213_s18, 4  ;;  %s264_s29 = scalar_lea.hbm %s785_s2, %s382_s21  ;;  %s267_s19 = int_to_ptr.vmem [resolvable:$true] %s266_s19 }
  0x3b   : > { %v223_v12 = vmax.f32 %v221_v0, 0.0  ;;  %v224_v13 = vmul.f32 %v222_v6, %v221_v0  ;;  %s253_s3 = scalar_lea.sflag [#allocation4], %s725_s25  ;;  %s513_s7 = scalar_lea.vmem %s267_s19, 128 }
  0x3c   : > { %v227_v2 = vsub.f32 0.0, %v226_v1  ;;  %v244_v11 = vsel %vm242_vm0, %v243_v8, %v221_v0  ;;  %v241_v15 = vadd.f32 0.75, %v240_v9  ;;  %p514_p8 = scmp.ne.s32.totalorder %s267_s19, %s513_s7  ;;  %s601_s8 = smov [#allocation7]  }
  0x3d   : > { %v245_v16 = vmul.f32 %v244_v11, %v244_v11  ;;  %v225_v19 = vsub.f32 %v223_v12, %v224_v13  ;;  %s517_s30 = sshll.u32 %s601_s8, 4  ;;  %s518_s30 = int_to_ptr.vmem [resolvable:$false] %s517_s30 }
  0x3e   : > { %v228_v3 = vmul.f32 1.442695, %v227_v2  ;;  %p515_p0 = pnand %p514_p8, %p668_p9  ;;  %s519_s4 = scalar_lea.vmem %s518_s30, 256 }
  0x3f   : > { %v246_v21 = vmul.f32 %v245_v16, %v241_v15  ;;  %p520_p13 = scmp.lt.s32.totalorder %s267_s19, %s518_s30  ;;  %p521_p5 = scmp.lt.s32.totalorder %s519_s4, %s513_s7 }
  0x40   : > { %453 = vpow2.f32 %v228_v3  ;;  %p516_p3 = pneg %p515_p0 }
  0x41   : > { %p522_p12 = por %p521_p5, %p520_p13 }
  0x43   : > { %p523_p6 = pnand %p522_p12, %p516_p3 }
  0x4d   : > { %v454_v4 = vpop.eup %453 }
  0x4e   : > { %v230_v5 = vadd.f32 1.0, %v454_v4  ;;  %v233_v7 = vmul.f32 -0.5, %v454_v4  ;;  %v236_v14 = vand.u32 2147483647, %v454_v4 }
  0x50   : > { %455 = vlog2.f32 %v230_v5  ;;  %v234_v10 = vadd.f32 1.0, %v233_v7  ;;  %vm237_vm1 = vcmp.lt.f32.partialorder %v236_v14, 0.0004427343 }
  0x52   : > { %v235_v17 = vmul.f32 %v454_v4, %v234_v10 }
  0x5d   : > { %v456_v18 = vpop.eup %455 }
  0x5e   : > { %v232_v20 = vmul.f32 0.6931472, %v456_v18 }
  0x60   : > { %v238_v22 = vsel %vm237_vm1, %v235_v17, %v232_v20 }
  0x61   : > { %v239_v23 = vadd.f32 %v238_v22, %v225_v19 }
  0x63   : > { %v247_v24 = vmul.f32 %v246_v21, %v239_v23 }
  0x65   : > { %251 = vst [vmem:[%s213_s18] sm:$0xff] %v247_v24 }
  0x66   : > { %526 = shalt.err (!%p523_p6)
}
  0x67   : > { %s527_s12 = scalar_lea.hbm %s264_s29, 128  ;;  %s531_s26 = scalar_lea.hbm %s785_s2, 256 }
  0x68   : > { %p528_p7 = scmp.ne.s32.totalorder %s264_s29, %s527_s12  ;;  %p532_p4 = scmp.lt.s32.totalorder %s264_s29, %s785_s2 }
  0x69   : > { %p533_p10 = scmp.lt.s32.totalorder %s531_s26, %s527_s12 }
  0x6a   : > { %p529_p1 = pnand %p528_p7, %p668_p9 }
  0x6b   : > { %p534_p8 = por %p533_p10, %p532_p4 }
  0x6c   : > { %p530_p2 = pneg %p529_p1 }
  0x6e   : > { %p535_p0 = pnand %p534_p8, %p530_p2 }
  0x70   : > { %538 = shalt.err (!%p535_p0)
}
  0x71   : > { %389 = dma.vmem_to_hbm [thread:$0]  (%p668_p9), %s267_s19, 128, %s264_s29, %s253_s3  }
  0x72 PF: > { %s278_s5 = sand.u32 1, %s577_s9   ;;  %p792_p3 = scmp.ge.s32.totalorder %s597_s14, 2 }
  0x73   : > { %s279_s16 = scalar_lea.sflag [#allocation4], %s278_s5 }
  0x74   : > { %p399_p13 = pnand %p792_p3, %p675_p11 }
  0x76   : > { %p400_p5 = pneg %p399_p13 }
  0x78   : > { %572 = dma.done.wait (%p400_p5), %s279_s16, 128  }
  0x79   : > { %574 = vsyncadd (%p400_p5), %s279_s16, 4294967168  ;;  %s21_s14 = sadd.s32 1, %s597_s14   ;;  %s793_s9 = smov %s581_s10 }
  0x7a   : > { %p18_p12 = scmp.ge.s32.totalorder %s21_s14, 4   ;;  %s794_s10 = smov %s585_s11 }
  0x7b   : > { %s795_s11 = smov %s673_s23  ;;  %s796_s12 = smov %s593_s13 }
  0x7c   : > { %s797_s13 = smov %s799_s17  ;;  %20 = sbr.rel (!%p18_p12) target bundleno = 8 (0x8), region = 90 }
  0x81   :  { %284 = vsyncpa [#allocation3], 1 }
  0x82   :  { %286 = vsyncpa [#allocation3 + $0x1], 1 }
  0x83   :  { %287 = vsyncpa [#allocation6], 1 }
  0x84   :  { %289 = vsyncpa [#allocation6 + $0x1], 1 }
  0x85   :  { %290 = vsyncpa [#allocation4], 1 }
  0x86   :  { %292 = vsyncpa [#allocation4 + $0x1], 1 }

</bundles_post_ra>
